<compile_context>
chip_gen: v7x
topology: tpu7x:2x2x1
jax: 0.10.0
libtpu: 0.0.40
codegen_flags: <defaults>
</compile_context>

<pallas_src>
import jax
import jax.numpy as jnp
from jax.experimental import pallas as pl
from jax.experimental.pallas import tpu as pltpu


def _round_up(x, m):
    return (x + m - 1) // m * m


def _cdiv(a, b):
    return (a + b - 1) // b


def _ffm_mul_kernel(a_ref, b_ref, o_ref):
    # a_ref/b_ref/o_ref: (tb, P*D) tiles; pure elementwise multiply.
    o_ref[...] = (a_ref[...] * b_ref[...]).astype(o_ref.dtype)


def field_aware_factorization_machine(x_idx, embed_tables, offsets, *, tb=None):
    """Field-aware FM pairwise-interaction forward.

    x_idx:        (B, F) integer field indices.
    embed_tables: (F, V, D) stacked embedding weights (V = sum(field_dims)).
    offsets:      (F,) integer per-field vocabulary offsets.
    Returns (B, F*(F-1)//2, D), matching the PyTorch module.
    """
    B, F = x_idx.shape
    Ft, V, D = embed_tables.shape
    assert Ft == F, "one embedding table per field required"
    P = F * (F - 1) // 2
    dtype = embed_tables.dtype
    if P == 0:
        return jnp.zeros((B, 0, D), dtype=dtype)

    # ---- static pair index vectors ------------------------------------------
    pi, pj = [], []
    for i in range(F - 1):
        for j in range(i + 1, F):
            pi.append(i)
            pj.append(j)
    pair_i = jnp.asarray(pi, jnp.int32)   # (P,)
    pair_j = jnp.asarray(pj, jnp.int32)   # (P,)

    # ---- gather directly into the two pairwise operands ---------------------
    # TODO(synk): the torch.nn.Embedding row gather is data-dependent; it is
    # done with jnp.take in the wrapper (XLA gather) rather than in-kernel.
    idx = x_idx.astype(jnp.int32) + offsets[None, :].astype(jnp.int32)   # (B, F)
    tables_flat = embed_tables.reshape(F * V, D)                         # (F*V, D)

    # A[b, k] = table j_k at field i_k  (xs[j][:, i])
    a_rows = jnp.take(idx, pair_i, axis=1) + pair_j[None, :] * V         # (B, P)
    # B[b, k] = table i_k at field j_k  (xs[i][:, j])
    b_rows = jnp.take(idx, pair_j, axis=1) + pair_i[None, :] * V         # (B, P)

    fout = P * D
    a_op = jnp.take(tables_flat, a_rows, axis=0).reshape(B, fout)        # (B, P*D)
    b_op = jnp.take(tables_flat, b_rows, axis=0).reshape(B, fout)        # (B, P*D)

    # ---- batch tile sizing ---------------------------------------------------
    itemsize = jnp.dtype(dtype).itemsize
    lane_w = _round_up(fout, 128)                 # VMEM tiles pad the lane dim
    row_bytes = 3 * lane_w * itemsize             # a + b + out, per batch row

    vmem_cap = 64 * 1024 * 1024                   # conservative default (v7x)
    try:
        vmem_cap = int(pltpu.get_tpu_info().vmem_capacity_bytes)
    except Exception:
        pass
    if vmem_cap >= 96 * 1024 * 1024:              # v5e / v6e (128 MiB VMEM)
        vmem_budget = 48 * 1024 * 1024
        vmem_limit = 64 * 1024 * 1024
    else:                                         # v7x (64 MiB VMEM)
        vmem_budget = 24 * 1024 * 1024
        vmem_limit = 48 * 1024 * 1024

    # double-buffered tiles must fit the working budget
    max_tb = max(8, (vmem_budget // (2 * row_bytes)) // 8 * 8)
    if tb is None:
        tb = 2048                                  # big streaming tiles
    # keep >= 2 grid steps when possible (megacore sharding on v7x)
    tb = min(_round_up(tb, 8), max_tb, _round_up(_cdiv(B, 2), 8))
    tb = max(8, tb)
    grid = (_cdiv(B, tb),)                         # ragged last block, no pad

    out_flat = pl.pallas_call(
        _ffm_mul_kernel,
        out_shape=jax.ShapeDtypeStruct((B, fout), dtype),
        grid_spec=pltpu.PrefetchScalarGridSpec(
            num_scalar_prefetch=0,
            grid=grid,
            in_specs=[pl.BlockSpec((tb, fout), lambda b: (b, 0)),
                      pl.BlockSpec((tb, fout), lambda b: (b, 0))],
            out_specs=pl.BlockSpec((tb, fout), lambda b: (b, 0)),
        ),
        compiler_params=pltpu.CompilerParams(
            dimension_semantics=("parallel",),
            vmem_limit_bytes=vmem_limit,
        ),
    )(a_op, b_op)

    return out_flat.reshape(B, P, D)


def field_aware_factorization_machine_ref(x_idx, embed_tables, offsets):
    """Pure-JAX reference mirroring the PyTorch module's forward."""
    F = x_idx.shape[1]
    idx = x_idx.astype(jnp.int32) + offsets[None, :].astype(jnp.int32)
    xs = jnp.take(embed_tables, idx, axis=1)          # (F, B, F, D)
    prods = []
    for i in range(F - 1):
        for j in range(i + 1, F):
            prods.append(xs[j, :, i, :] * xs[i, :, j, :])
    return jnp.stack(prods, axis=1)


if __name__ == "__main__":
    key = jax.random.PRNGKey(0)
    k_idx, k_emb = jax.random.split(key)

    field_dims = (3, 4, 5, 6)          # num_fields = 4, vocab = 18
    embed_dim = 16
    B = 6
    F = len(field_dims)
    V = int(sum(field_dims))
    P = F * (F - 1) // 2

    offs = [0]
    for d in field_dims[:-1]:
        offs.append(offs[-1] + d)
    offsets = jnp.asarray(offs, dtype=jnp.int32)

    x_idx = (
        jax.random.randint(k_idx, (B, F), 0, 10_000, dtype=jnp.int32)
        % jnp.asarray(field_dims, dtype=jnp.int32)[None, :]
    )
    embed_tables = jax.random.uniform(
        k_emb, (F, V, embed_dim), dtype=jnp.float32, minval=-0.5, maxval=0.5)

    out = field_aware_factorization_machine(x_idx, embed_tables, offsets)
    out = jax.block_until_ready(out)

    ref = field_aware_factorization_machine_ref(x_idx, embed_tables, offsets)
    assert out.shape == (B, P, embed_dim), out.shape
    assert jnp.allclose(out, ref, atol=1e-6, rtol=1e-6), "mismatch vs reference"

    print("KERNEL_OK")
</pallas_src>

<mosaic_0001>
module attributes {stable_mosaic.version = 11 : i64} {
  func.func @_ffm_mul_kernel(%arg0: i32, %arg1: memref<8x96xf32, #tpu.memory_space<vmem>>, %arg2: memref<8x96xf32, #tpu.memory_space<vmem>>, %arg3: memref<8x96xf32, #tpu.memory_space<vmem>>) attributes {dimension_semantics = [#tpu.dimension_semantics<parallel>], iteration_bounds = array<i64: 1>, scalar_prefetch = 0 : i64, scratch_operands = 0 : i64, tpu.core_type = #tpu.core_type<tc>, window_params = [{transform_indices = @transform_0, window_bounds = array<i64: 8, 96>}, {transform_indices = @transform_1, window_bounds = array<i64: 8, 96>}, {transform_indices = @transform_2, window_bounds = array<i64: 8, 96>}]} {
    %c0 = arith.constant 0 : index
    %c0_0 = arith.constant 0 : index
    %0 = vector.load %arg1[%c0, %c0_0] : memref<8x96xf32, #tpu.memory_space<vmem>>, vector<8x96xf32>
    %c0_1 = arith.constant 0 : index
    %c0_2 = arith.constant 0 : index
    %1 = vector.load %arg2[%c0_1, %c0_2] : memref<8x96xf32, #tpu.memory_space<vmem>>, vector<8x96xf32>
    %2 = arith.mulf %0, %1 : vector<8x96xf32>
    %c0_3 = arith.constant 0 : index
    %c0_4 = arith.constant 0 : index
    %3 = vector.load %arg3[%c0_3, %c0_4] : memref<8x96xf32, #tpu.memory_space<vmem>>, vector<8x96xf32>
    tpu.vector_store %arg3[%c0_3, %c0_4], %2 {strides = array<i32>} : memref<8x96xf32, #tpu.memory_space<vmem>>, vector<8x96xf32>,
    return
  }
  func.func @transform_0(%arg0: i32) -> (i32, i32) {
    %c0_i32 = arith.constant 0 : i32
    %c0_i32_0 = arith.constant 0 : i32
    return %arg0, %c0_i32 : i32, i32
  }
  func.func @transform_1(%arg0: i32) -> (i32, i32) {
    %c0_i32 = arith.constant 0 : i32
    %c0_i32_0 = arith.constant 0 : i32
    return %arg0, %c0_i32 : i32, i32
  }
  func.func @transform_2(%arg0: i32) -> (i32, i32) {
    %c0_i32 = arith.constant 0 : i32
    %c0_i32_0 = arith.constant 0 : i32
    return %arg0, %c0_i32 : i32, i32
  }
}

</mosaic_0001>

<bundles_post_ra>
// kernel: tpu_custom_call.1
= control target key start
LH: loop header
LB: loop body
LE: loop exit
PB: predicated region body
PF: predicated region fallthrough
CT: control target
= control target key end

     0   :  { %7 = vsyncpa [#allocation3], 0  ;;  %s186_s0 = inlined_call_operand.hbm [shape: f32[6,96], index: 0, kind: input, shape index: {}]   ;;  %s187_s1 = inlined_call_operand.hbm [shape: f32[6,96], index: 1, kind: input, shape index: {}]   ;;  %s188_s2 = inlined_call_operand.hbm [shape: f32[6,96], index: 2, kind: output, shape index: {}]  }
   0x1   :  { %8 = vsyncpa [#allocation6], 0 }
   0x2   :  { %9 = vsyncpa [#allocation4], 0  ;;  %s132_s9 = smov [#allocation2]   ;;  %s133_s11 = smov [#allocation5]  }
   0x3   :  { %s16_s10 = sshll.u32 %s132_s9, 4  ;;  %s26_s12 = sshll.u32 %s133_s11, 4  ;;  %s17_s10 = int_to_ptr.vmem [resolvable:$true] %s16_s10  ;;  %s27_s12 = int_to_ptr.vmem [resolvable:$true] %s26_s12 }
   0x4   :  { %s60_s15 = scalar_lea.hbm %s186_s0, 128 }
   0x5   :  { %p61_p0 = scmp.ne.s32.totalorder %s186_s0, %s60_s15  ;;  %p64_p1 = scmp.lt.u32.totalorder %s60_s15, %s186_s0 }
   0x7   :  { %p66_p2 = pnand %p64_p1, %p61_p0 }
   0x9   :  { %69 = shalt.err (!%p66_p2)
}
   0xa   :  { %s70_s20 = scalar_lea.vmem %s17_s10, 128  ;;  %p75_p4 = scmp.lt.s32.totalorder %s17_s10, %s17_s10 }
   0xb   :  { %p71_p3 = scmp.ne.s32.totalorder %s17_s10, %s70_s20  ;;  %p76_p5 = scmp.lt.s32.totalorder %s70_s20, %s70_s20 }
   0xd   :  { %p77_p6 = por %p76_p5, %p75_p4 }
   0xf   :  { %p78_p7 = pnand %p77_p6, %p71_p3 }
  0x11   :  { %81 = shalt.err (!%p78_p7)
}
  0x12   :  { %19 = dma.hbm_to_vmem [thread:$0]  %s186_s0, 128, %s17_s10, [#allocation3]  }
  0x13   :  { %s82_s25 = scalar_lea.hbm %s187_s1, 128 }
  0x14   :  { %p83_p8 = scmp.ne.s32.totalorder %s187_s1, %s82_s25  ;;  %p86_p9 = scmp.lt.u32.totalorder %s82_s25, %s187_s1 }
  0x16   :  { %p88_p10 = pnand %p86_p9, %p83_p8 }
  0x18   :  { %91 = shalt.err (!%p88_p10)
}
  0x19   :  { %s92_s30 = scalar_lea.vmem %s27_s12, 128  ;;  %p97_p12 = scmp.lt.s32.totalorder %s27_s12, %s27_s12 }
  0x1a   :  { %p93_p11 = scmp.ne.s32.totalorder %s27_s12, %s92_s30  ;;  %p98_p13 = scmp.lt.s32.totalorder %s92_s30, %s92_s30 }
  0x1c   :  { %p99_p0 = por %p98_p13, %p97_p12 }
  0x1e   :  { %p100_p1 = pnand %p99_p0, %p93_p11 }
  0x20   :  { %103 = shalt.err (!%p100_p1)
}
  0x21   :  { %29 = dma.hbm_to_vmem [thread:$0]  %s187_s1, 128, %s27_s12, [#allocation6]  }
  0x22   :  { %126 = dma.done.wait [#allocation3], 128  }
  0x23   :  { %127 = vsyncadd [#allocation3], 4294967168 }
  0x24   :  { %128 = dma.done.wait [#allocation6], 128  }
  0x25   :  { %129 = vsyncadd [#allocation6], 4294967168  ;;  %s134_s4 = smov [#allocation7]   ;;  %v36_v0 = vld [vmem:[#allocation2] sm:$0xff]  ;;  %v37_v1 = vld [vmem:[#allocation5] sm:$0xff]  ;;  %vm39_vm0 = vcmask 785408  }
  0x26   :  { %s47_s5 = sshll.u32 %s134_s4, 4  ;;  %v38_v2 = vmul.f32 %v37_v1, %v36_v0  ;;  %s48_s5 = int_to_ptr.vmem [resolvable:$true] %s47_s5 }
  0x27   :  { %s104_s6 = scalar_lea.vmem %s48_s5, 128  ;;  %p109_p3 = scmp.lt.s32.totalorder %s48_s5, %s48_s5 }
  0x28   :  { %40 = vst.msk [vmem:[#allocation7] sm:$0xff] %vm39_vm0, %v38_v2  ;;  %p105_p2 = scmp.ne.s32.totalorder %s48_s5, %s104_s6  ;;  %p110_p4 = scmp.lt.s32.totalorder %s104_s6, %s104_s6 }
  0x2a   :  { %p111_p5 = por %p110_p4, %p109_p3 }
  0x2c   :  { %p112_p6 = pnand %p111_p5, %p105_p2 }
  0x2e   :  { %115 = shalt.err (!%p112_p6)
}
  0x2f   :  { %s116_s8 = scalar_lea.hbm %s188_s2, 128 }
  0x30   :  { %p117_p7 = scmp.ne.s32.totalorder %s188_s2, %s116_s8  ;;  %p120_p8 = scmp.lt.u32.totalorder %s116_s8, %s188_s2 }
  0x32   :  { %p122_p9 = pnand %p120_p8, %p117_p7 }
  0x34   :  { %125 = shalt.err (!%p122_p9)
}
  0x35   :  { %50 = dma.vmem_to_hbm [thread:$0]  %s48_s5, 128, %s188_s2, [#allocation4]  }
  0x36   :  { %130 = dma.done.wait [#allocation4], 128  }
  0x37   :  { %131 = vsyncadd [#allocation4], 4294967168 }
  0x38   :  { %54 = vsyncpa [#allocation3], 1 }
  0x39   :  { %55 = vsyncpa [#allocation6], 1 }
  0x3a   :  { %56 = vsyncpa [#allocation4], 1 }

</bundles_post_ra>
